<compile_context>
chip_gen: v5e
topology: v5e:2x2
jax: 0.10.0
libtpu: 0.0.40
codegen_flags: <defaults>
</compile_context>

<pallas_src>
import functools
import jax
import jax.numpy as jnp
from jax.experimental import pallas as pl
from jax.experimental.pallas import tpu as pltpu


def _focal_loss_kernel(x_ref, t_ref, a_ref, o_ref, *, gamma, t_hw, hw, has_alpha):
    # x_ref: (1, C, T) logits block   — classes on sublanes, pixels on lanes
    # t_ref: (1, 1, T) int32 targets
    # a_ref: (C, 1)    per-class alpha (unused when has_alpha=False)
    # o_ref: (1, 1, 1, 1) per-tile partial sum
    x = x_ref[0].astype(jnp.float32)                            # (C, T)
    t = t_ref[0]                                                # (1, T) int32

    # log-softmax over the class (sublane) axis, without materializing logp
    m = jnp.max(x, axis=0, keepdims=True)                       # (1, T)
    lse = jnp.log(jnp.sum(jnp.exp(x - m), axis=0, keepdims=True))

    # gather(target) via one-hot over the class axis
    cls = jax.lax.broadcasted_iota(jnp.int32, x.shape, 0)       # (C, T)
    onehot = (cls == t).astype(jnp.float32)                     # (C, T)
    x_t = jnp.sum(x * onehot, axis=0, keepdims=True)            # (1, T)
    logpt = x_t - m - lse                                       # (1, T)
    pt = jnp.exp(logpt)                                         # pt before alpha

    if has_alpha:
        a = a_ref[...].astype(jnp.float32)                      # (C, 1)
        at = jnp.sum(a * onehot, axis=0, keepdims=True)         # (1, T) = alpha[target]
        logpt = logpt * at

    if gamma == 0:
        loss = -logpt
    else:
        one_m_pt = jnp.maximum(1.0 - pt, 0.0)  # clamp: exp rounding can give pt > 1
        g = float(gamma)
        if g.is_integer() and 1 <= int(g) <= 8:
            w = one_m_pt
            for _ in range(int(g) - 1):        # integer gamma -> cheap VPU multiply chain
                w = w * one_m_pt
        else:
            w = one_m_pt ** g
        loss = -w * logpt

    # mask padded pixels on the ragged last lane tile (static no-op if T | HW)
    if hw % t_hw != 0:
        j = pl.program_id(1)
        col = j * t_hw + jax.lax.broadcasted_iota(jnp.int32, loss.shape, 1)
        loss = jnp.where(col < hw, loss, 0.0)

    o_ref[...] = jnp.sum(loss, keepdims=True).reshape(1, 1, 1, 1)


def _pick_lane_tile(hw, c):
    """Pick the pixel (lane) tile: multiple of 128, VMEM-budget driven."""
    # ~x block (double-buffered) + live f32 intermediates per pixel column;
    # keep the working set a few MiB so it fits comfortably on v7x (64 MiB VMEM)
    # as well as v5e/v6e.
    budget_bytes = 8 * 1024 * 1024
    per_col = 4 * (10 * c + 8)
    t = budget_bytes // per_col
    t = max(128, min(t, 16384))
    t = (t // 128) * 128
    if hw % 128 == 0:
        return min(t, hw)
    if hw > t:
        return t            # ragged last tile, masked in-kernel
    return hw               # full extent satisfies the TPU block-layout rule


def focal_loss(logits_nchw, target, *, gamma=0.0, alpha=None, size_average=True):
    """logits_nchw: (N, C, *spatial) float; target: (N, *spatial) int class ids.

    Matches PyTorch FocalLoss.forward: per-pixel log_softmax over classes,
    gather target, optional alpha weighting of logpt (pt taken pre-alpha),
    loss = -(1-pt)**gamma * logpt, then mean or sum.
    """
    n, c = logits_nchw.shape[0], logits_nchw.shape[1]
    hw = 1
    for d in logits_nchw.shape[2:]:
        hw *= d

    # Free reshapes only (no transpose / pad / copy): keep NCHW memory order.
    x3 = logits_nchw.reshape(n, c, hw)
    t3 = target.reshape(n, 1, hw).astype(jnp.int32)

    has_alpha = alpha is not None
    if has_alpha:
        a = jnp.asarray(alpha, dtype=jnp.float32).reshape(c, 1)
    else:
        a = jnp.ones((c, 1), dtype=jnp.float32)   # statically skipped in-kernel

    # TODO(synk): very large C (e.g. >= 2048) would need a C-tiled grid with an
    # online (running max/sum) softmax; here the full class axis lives in one block.
    t_hw = _pick_lane_tile(hw, c)
    p_tiles = pl.cdiv(hw, t_hw)
    grid = (n, p_tiles)

    kernel = functools.partial(
        _focal_loss_kernel, gamma=gamma, t_hw=t_hw, hw=hw, has_alpha=has_alpha)

    partials = pl.pallas_call(
        kernel,
        out_shape=jax.ShapeDtypeStruct((n, p_tiles, 1, 1), jnp.float32),
        grid_spec=pltpu.PrefetchScalarGridSpec(
            num_scalar_prefetch=0,
            grid=grid,
            in_specs=[
                pl.BlockSpec((1, c, t_hw), lambda i, j: (i, 0, j)),   # logits
                pl.BlockSpec((1, 1, t_hw), lambda i, j: (i, 0, j)),   # targets
                pl.BlockSpec((c, 1), lambda i, j: (0, 0)),            # alpha
            ],
            out_specs=pl.BlockSpec((1, 1, 1, 1), lambda i, j: (i, j, 0, 0)),
        ),
        compiler_params=pltpu.CompilerParams(
            dimension_semantics=("parallel", "parallel"),
            vmem_limit_bytes=32 * 1024 * 1024),
    )(x3, t3, a)

    loss_sum = jnp.sum(partials)
    n_rows = n * hw
    if size_average:
        return loss_sum / jnp.float32(n_rows)
    return loss_sum


def _focal_loss_ref(logits_nchw, target, *, gamma=0.0, alpha=None,
                    size_average=True):
    c = logits_nchw.shape[1]
    x = jnp.moveaxis(logits_nchw.reshape(logits_nchw.shape[0], c, -1), 1, -1)
    x = x.reshape(-1, c).astype(jnp.float32)
    t = target.reshape(-1).astype(jnp.int32)
    logp = jax.nn.log_softmax(x, axis=-1)
    logpt = jnp.take_along_axis(logp, t[:, None], axis=1)[:, 0]
    pt = jnp.exp(logpt)
    if alpha is not None:
        at = jnp.asarray(alpha, jnp.float32)[t]
        logpt = logpt * at
    loss = -((1.0 - pt) ** gamma) * logpt if gamma != 0 else -logpt
    return loss.mean() if size_average else loss.sum()


if __name__ == "__main__":
    key = jax.random.PRNGKey(0)
    kx, kt = jax.random.split(key)
    N, C, H, W = 2, 4, 16, 16
    x = jax.random.normal(kx, (N, C, H, W), dtype=jnp.float32)
    tgt = jax.random.randint(kt, (N, H, W), 0, C, dtype=jnp.int32)

    # FocalLoss(gamma=2, alpha=None, size_average=True)
    out = focal_loss(x, tgt, gamma=2.0, alpha=None, size_average=True)
    out = jax.block_until_ready(out)
    ref = _focal_loss_ref(x, tgt, gamma=2.0, alpha=None, size_average=True)
    assert jnp.allclose(out, ref, rtol=1e-5, atol=1e-5), (out, ref)

    # per-class alpha + sum reduction path
    alpha = jnp.array([0.25, 0.75, 0.5, 1.0], dtype=jnp.float32)
    out2 = focal_loss(x, tgt, gamma=2.0, alpha=alpha, size_average=False)
    out2 = jax.block_until_ready(out2)
    ref2 = _focal_loss_ref(x, tgt, gamma=2.0, alpha=alpha, size_average=False)
    assert jnp.allclose(out2, ref2, rtol=1e-5, atol=1e-4), (out2, ref2)

    print("KERNEL_OK")
</pallas_src>

<mosaic_0001>
module attributes {stable_mosaic.version = 11 : i64} {
  func.func @_focal_loss_kernel(%arg0: i32, %arg1: i32, %arg2: memref<1x4x256xf32, #tpu.memory_space<vmem>>, %arg3: memref<1x1x256xi32, #tpu.memory_space<vmem>>, %arg4: memref<4x1xf32, #tpu.memory_space<vmem>>, %arg5: memref<1x1x1x1xf32, #tpu.memory_space<vmem>>) attributes {dimension_semantics = [#tpu.dimension_semantics<parallel>, #tpu.dimension_semantics<parallel>], iteration_bounds = array<i64: 2, 1>, scalar_prefetch = 0 : i64, scratch_operands = 0 : i64, tpu.core_type = #tpu.core_type<tc>, window_params = [{transform_indices = @transform_0, window_bounds = array<i64: 1, 4, 256>}, {transform_indices = @transform_1, window_bounds = array<i64: 1, 1, 256>}, {pipeline_mode = #tpu.pipeline_mode<synchronous>, transform_indices = @transform_2, window_bounds = array<i64: 4, 1>}, {transform_indices = @transform_3, window_bounds = array<i64: 1, 1, 1, 1>}]} {
    %c0 = arith.constant 0 : index
    %c0_0 = arith.constant 0 : index
    %c0_1 = arith.constant 0 : index
    %0 = vector.load %arg2[%c0, %c0_0, %c0_1] : memref<1x4x256xf32, #tpu.memory_space<vmem>>, vector<1x4x256xf32>
    %1 = vector.shape_cast %0 : vector<1x4x256xf32> to vector<4x256xf32>
    %c0_2 = arith.constant 0 : index
    %c0_3 = arith.constant 0 : index
    %c0_4 = arith.constant 0 : index
    %2 = vector.load %arg3[%c0_2, %c0_3, %c0_4] : memref<1x1x256xi32, #tpu.memory_space<vmem>>, vector<1x1x256xi32>
    %3 = vector.shape_cast %2 : vector<1x1x256xi32> to vector<1x256xi32>
    %cst = arith.constant dense<0xFF800000> : vector<256xf32>
    %4 = vector.multi_reduction <maximumf>, %1, %cst [0] : vector<4x256xf32> to vector<256xf32>
    %5 = vector.shape_cast %4 : vector<256xf32> to vector<1x256xf32>
    %6 = vector.broadcast %5 : vector<1x256xf32> to vector<4x256xf32>
    %7 = arith.subf %1, %6 : vector<4x256xf32>
    %8 = math.exp %7 : vector<4x256xf32>
    %cst_5 = arith.constant dense<0.000000e+00> : vector<256xf32>
    %9 = vector.multi_reduction <add>, %8, %cst_5 [0] : vector<4x256xf32> to vector<256xf32>
    %10 = vector.shape_cast %9 : vector<256xf32> to vector<1x256xf32>
    %11 = math.log %10 : vector<1x256xf32>
    %12 = tpu.iota {dimensions = array<i32: 0>} : vector<4x256xi32>
    %13 = vector.broadcast %3 : vector<1x256xi32> to vector<4x256xi32>
    %14 = arith.cmpi eq, %12, %13 : vector<4x256xi32>
    %15 = arith.extui %14 : vector<4x256xi1> to vector<4x256xi32>
    %16 = arith.sitofp %15 : vector<4x256xi32> to vector<4x256xf32>
    %17 = arith.mulf %1, %16 : vector<4x256xf32>
    %cst_6 = arith.constant dense<0.000000e+00> : vector<256xf32>
    %18 = vector.multi_reduction <add>, %17, %cst_6 [0] : vector<4x256xf32> to vector<256xf32>
    %19 = vector.shape_cast %18 : vector<256xf32> to vector<1x256xf32>
    %20 = arith.subf %19, %5 : vector<1x256xf32>
    %21 = arith.subf %20, %11 : vector<1x256xf32>
    %22 = math.exp %21 : vector<1x256xf32>
    %cst_7 = arith.constant 1.000000e+00 : f32
    %23 = vector.broadcast %cst_7 : f32 to vector<1x256xf32>
    %24 = arith.subf %23, %22 : vector<1x256xf32>
    %cst_8 = arith.constant 0.000000e+00 : f32
    %25 = vector.broadcast %cst_8 : f32 to vector<1x256xf32>
    %26 = arith.maximumf %24, %25 : vector<1x256xf32>
    %27 = arith.mulf %26, %26 : vector<1x256xf32>
    %cst_9 = arith.constant 0.000000e+00 : f32
    %28 = vector.broadcast %cst_9 : f32 to vector<1x256xf32>
    %29 = arith.subf %28, %27 : vector<1x256xf32>
    %30 = arith.mulf %29, %21 : vector<1x256xf32>
    %31 = vector.shape_cast %30 : vector<1x256xf32> to vector<1x1x256xf32>
    %cst_10 = arith.constant dense<0.000000e+00> : vector<1xf32>
    %32 = vector.multi_reduction <add>, %31, %cst_10 [1, 2] : vector<1x1x256xf32> to vector<1xf32>
    %33 = vector.shape_cast %32 : vector<1xf32> to vector<1x1x1xf32>
    %34 = vector.extract %33[0, 0, 0] : f32 from vector<1x1x1xf32>
    %35 = vector.broadcast %34 : f32 to vector<1x1xf32>
    %36 = vector.shape_cast %35 : vector<1x1xf32> to vector<1x1x1x1xf32>
    %c0_11 = arith.constant 0 : index
    %c0_12 = arith.constant 0 : index
    %c0_13 = arith.constant 0 : index
    %c0_14 = arith.constant 0 : index
    %37 = vector.load %arg5[%c0_11, %c0_12, %c0_13, %c0_14] : memref<1x1x1x1xf32, #tpu.memory_space<vmem>>, vector<1x1x1x1xf32>
    tpu.vector_store %arg5[%c0_11, %c0_12, %c0_13, %c0_14], %36 {strides = array<i32>} : memref<1x1x1x1xf32, #tpu.memory_space<vmem>>, vector<1x1x1x1xf32>,
    return
  }
  func.func @transform_0(%arg0: i32, %arg1: i32) -> (i32, i32, i32) {
    %c0_i32 = arith.constant 0 : i32
    %c0_i32_0 = arith.constant 0 : i32
    return %arg0, %c0_i32, %arg1 : i32, i32, i32
  }
  func.func @transform_1(%arg0: i32, %arg1: i32) -> (i32, i32, i32) {
    %c0_i32 = arith.constant 0 : i32
    %c0_i32_0 = arith.constant 0 : i32
    return %arg0, %c0_i32, %arg1 : i32, i32, i32
  }
  func.func @transform_2(%arg0: i32, %arg1: i32) -> (i32, i32) {
    %c0_i32 = arith.constant 0 : i32
    %c0_i32_0 = arith.constant 0 : i32
    %c0_i32_1 = arith.constant 0 : i32
    return %c0_i32, %c0_i32_0 : i32, i32
  }
  func.func @transform_3(%arg0: i32, %arg1: i32) -> (i32, i32, i32, i32) {
    %c0_i32 = arith.constant 0 : i32
    %c0_i32_0 = arith.constant 0 : i32
    %c0_i32_1 = arith.constant 0 : i32
    return %arg0, %arg1, %c0_i32, %c0_i32_0 : i32, i32, i32, i32
  }
}

</mosaic_0001>

<bundles_post_ra>
// kernel: tpu_custom_call.1
= control target key start
LH: loop header
LB: loop body
LE: loop exit
PB: predicated region body
PF: predicated region fallthrough
CT: control target
= control target key end

     0   :  { %8 = vsyncpa [#allocation3], 0  ;;  %s754_s0 = inlined_call_operand.hbm [shape: f32[2,4,256], index: 0, kind: input, shape index: {}]   ;;  %s755_s1 = inlined_call_operand.vmem [shape: s32[2,1,256], index: 1, kind: input, shape index: {}]   ;;  %s756_s2 = inlined_call_operand.vmem [shape: f32[4,1], index: 2, kind: input, shape index: {}]   ;;  %s757_s3 = inlined_call_operand.vmem [shape: f32[2,1,1,1], index: 3, kind: output, shape index: {}]  }
   0x1   :  { %10 = vsyncpa [#allocation3 + $0x1], 0  ;;  %s651_s12 = smov 0   ;;  %s653_s13 = smov 0  }
   0x2   :  { %s655_s14 = smov 0   ;;  %s657_s15 = smov 0  }
   0x3   :  { %s659_s16 = smov 0   ;;  %s661_s17 = smov 0  }
   0x4 LB: > { %s465_s2 = sadd.s32 4294967295, %s628_s17   ;;  %s28_s18 = sadd.s32 1, %s624_s16  ;;  %s628_s17 = sphi %s661_s17, %s16_s17   ;;  %s624_s16 = sphi %s659_s16, %s764_s16   ;;  %s620_s15 = sphi %s657_s15, %s763_s15   ;;  %s616_s14 = sphi %s655_s14, %s762_s14   ;;  %s612_s13 = sphi %s653_s13, %s761_s13   ;;  %s608_s12 = sphi %s651_s12, %s760_s12  }
   0x5   : > { %p30_p0 = scmp.ge.s32.totalorder %s28_s18, 2  ;;  %s37_s19 = sadd.s32 1, %s616_s14 }
   0x6   : > { %p44_p1 = scmp.ne.s32.totalorder %s616_s14, %s612_s13  ;;  %p45_p2 = scmp.eq.s32.totalorder %s628_s17, 0 }
   0x7   : > { %s766_s18 = smov (%p30_p0, %s28_s18), 0  ;;  %p50_p4 = scmp.ne.s32.totalorder %s612_s13, %s608_s12 }
   0x8   : > { %p687_p3 = por %p45_p2, %p44_p1  ;;  %s32_s21 = ssub.s32 %s624_s16, %s766_s18 }
   0x9   : > { %p51_p5 = scmp.eq.s32.totalorder %s465_s2, 0  ;;  %p35_p6 = scmp.eq.s32.totalorder %s32_s21, 0 }
   0xa   : > { %p488_p8 = scmp.lt.s32.totalorder %s628_s17, 2  ;;  %s154_s24 = sand.u32 1, %s616_s14  }
   0xb   : > { %p694_p7 = por %p51_p5, %p50_p4  ;;  %s479_s25 = sshll.u32 %s624_s16, 3 }
   0xc   : > { %s700_s23 = scalar_select %p35_p6, %s616_s14, %s37_s19  }
   0xd   : > { %s469_s26 = sshll.u32 %s154_s24, 3  ;;  %s165_s29 = scalar_lea.hbm %s754_s0, %s479_s25 }
   0xe   : > { %s167_s30 = sshll.u32 %s165_s29, 4  ;;  %s158_s4 = scalar_lea.vmem [#allocation2], %s469_s26  ;;  %s168_s30 = int_to_ptr.hbm [resolvable:$true] %s167_s30 }
   0xf   : > { %s169_s5 = sshll.u32 %s158_s4, 4  ;;  %p485_p9 = pnand %p488_p8, %p687_p3  ;;  %s170_s5 = int_to_ptr.vmem [resolvable:$true] %s169_s5 }
  0x10   : > { %p472_p10 = scmp.ge.s32.totalorder %s628_s17, 1  ;;  %p186_p11 = scmp.lt.s32.totalorder %s628_s17, 3 }
  0x11   : > { %s155_s6 = scalar_lea.sflag [#allocation3], %s154_s24 }
  0x12   : > { %487 = dma.hbm_to_vmem [thread:$0]  (!%p485_p9), %s168_s30, 128, %s170_s5, %s155_s6  }
  0x13   : > { %p187_p12 = pnand %p472_p10, %p186_p11 }
  0x14   : > { %s192_s7 = sand.u32 (!%p187_p12), 1, %s612_s13  }
  0x15   : > { %190 = sbr.rel (%p187_p12) target bundleno = 299 (0x12b), region = 32  ;;  %s473_s8 = sshll.u32 (!%p187_p12), %s192_s7, 3 }
  0x16   : > { %s193_s9 = scalar_lea.sflag (!%p187_p12), [#allocation3], %s192_s7  ;;  %s196_s10 = scalar_lea.vmem (!%p187_p12), [#allocation2], %s473_s8 }
  0x1a   : > { %603 = dma.done.wait (%p694_p7), %s193_s9, 128  }
  0x1b   : > { %605 = vsyncadd (%p694_p7), %s193_s9, 4294967168  ;;  %v245_v0 = vld [vmem:[%s196_s10] sm:$0xff]  ;;  %p231_p13 = scmp.lt.s32.totalorder %s620_s15, 1  ;;  %vm253_vm0 = vcmask 1043456   ;;  %v300_v15 = vlaneseq  ;;  %v630_v26 = vmov 0.0   ;;  %vm354_vm3 = vcmask 1040384  }
  0x1c   : > { %248 = vst [vmem:[#allocation1] ss:$2 sm:$0xff] %v245_v0  ;;  %vm368_vm4 = vcmask 0  }
  0x1d   : > { %s768_s15 = smov (!%p231_p13, %s620_s15), 1  ;;  %v301_v20 = vshrl.u32 %v300_v15, 7 }
  0x1e   : > { %s474_s11 = sshll.u32 %s768_s15, 1  ;;  %s244_s22 = scalar_lea.vmem %s757_s3, %s768_s15 }
  0x1f   : > { %s237_s19 = scalar_lea.vmem %s755_s1, %s474_s11 }
  0x20   : > { %v246_v16 = vld [vmem:[%s237_s19] sm:$0x3] }
  0x21   : > { %v303_v21 = vperm.slane %v246_v16, 1  ;;  %v302_v25 = vperm.slane %v246_v16, 0 }
  0x23   : > { %v249_v1 = vld.sshfl [vmem:[#allocation1] sm:$0xff pattern:$0x75316420]  ;;  %v250_v2 = vld.sshfl [vmem:[#allocation1 + $0x8] sm:$0xff pattern:$0x75316420]  ;;  %vm305_vm1 = vcmp.eq.s32.totalorder %v301_v20, %v303_v21  ;;  %vm304_vm2 = vcmp.eq.s32.totalorder %v301_v20, %v302_v25 }
  0x24   : > { %v254_v3 = vsel %vm253_vm0, %v249_v1, -inf  ;;  %v261_v4 = vsel %vm253_vm0, %v250_v2, -inf  ;;  %v476_v27 = vsel %vm305_vm1, 1.0, %v630_v26  ;;  %v475_v29 = vsel %vm304_vm2, 1.0, %v630_v26 }
  0x25   : > { %v255_v5 = vrot.slane %v254_v3, 4  ;;  %v262_v6 = vrot.slane %v261_v4, 4  ;;  %v312_v28 = vrot.slane %v476_v27, 4 }
  0x27   : > { %v256_v7 = vmax.f32 %v254_v3, %v255_v5  ;;  %v263_v8 = vmax.f32 %v261_v4, %v262_v6  ;;  %v313_v31 = vsel %vm253_vm0, %v475_v29, %v312_v28 }
  0x28   : > { %v315_v32 = vmul.f32 %v313_v31, %v245_v0 }
  0x29   : > { %v257_v9 = vrot.slane %v256_v7, 2  ;;  %v264_v10 = vrot.slane %v263_v8, 2 }
  0x2b   : > { %v258_v11 = vmax.f32 %v256_v7, %v257_v9  ;;  %v265_v12 = vmax.f32 %v263_v8, %v264_v10 }
  0x2d   : > { %v259_v13 = vrot.slane %v258_v11, 1  ;;  %v266_v14 = vrot.slane %v265_v12, 1 }
  0x2f   : > { %v260_v17 = vmax.f32 %v258_v11, %v259_v13  ;;  %v267_v18 = vmax.f32 %v265_v12, %v266_v14 }
  0x31   : > { %v270_v19 = vrot.slane %v267_v18, 4 }
  0x33   : > { %v271_v22 = vsel %vm253_vm0, %v260_v17, %v270_v19 }
  0x34   : > { %v273_v23 = vsub.f32 %v245_v0, %v271_v22 }
  0x36   : > { %v274_v24 = vmul.f32 1.442695, %v273_v23 }
  0x38   : > { %538 = vpow2.f32 %v274_v24 }
  0x3e   : > { %v539_v30 = vpop.eup %538 }
  0x3f   : > { %277 = vst [vmem:[#allocation1] ss:$2 sm:$0xff] %v539_v30 }
  0x46   : > { %v278_v33 = vld.sshfl [vmem:[#allocation1] sm:$0xff pattern:$0x75316420]  ;;  %v279_v34 = vld.sshfl [vmem:[#allocation1 + $0x8] sm:$0xff pattern:$0x75316420] }
  0x47   : > { %v282_v35 = vsel %vm253_vm0, %v278_v33, 0.0  ;;  %v289_v36 = vsel %vm253_vm0, %v279_v34, 0.0  ;;  %317 = vst [vmem:[#allocation1] ss:$2 sm:$0xff] %v315_v32 }
  0x48   : > { %v283_v37 = vrot.slane %v282_v35, 4  ;;  %v290_v38 = vrot.slane %v289_v36, 4 }
  0x4a   : > { %v284_v39 = vadd.f32 %v283_v37, %v282_v35  ;;  %v291_v40 = vadd.f32 %v290_v38, %v289_v36 }
  0x4c   : > { %v285_v41 = vrot.slane %v284_v39, 2  ;;  %v292_v42 = vrot.slane %v291_v40, 2 }
  0x4e   : > { %v286_v43 = vadd.f32 %v285_v41, %v284_v39  ;;  %v293_v44 = vadd.f32 %v292_v42, %v291_v40  ;;  %v318_v45 = vld.sshfl [vmem:[#allocation1] sm:$0xff pattern:$0x75316420]  ;;  %v319_v46 = vld.sshfl [vmem:[#allocation1 + $0x8] sm:$0xff pattern:$0x75316420] }
  0x4f   : > { %v322_v47 = vsel %vm253_vm0, %v318_v45, 0.0  ;;  %v329_v48 = vsel %vm253_vm0, %v319_v46, 0.0 }
  0x50   : > { %v287_v49 = vrot.slane %v286_v43, 1  ;;  %v294_v50 = vrot.slane %v293_v44, 1  ;;  %v323_v51 = vrot.slane %v322_v47, 4  ;;  %v330_v52 = vrot.slane %v329_v48, 4 }
  0x52   : > { %v288_v53 = vadd.f32 %v287_v49, %v286_v43  ;;  %v295_v54 = vadd.f32 %v294_v50, %v293_v44  ;;  %v324_v55 = vadd.f32 %v323_v51, %v322_v47  ;;  %v331_v56 = vadd.f32 %v330_v52, %v329_v48 }
  0x54   : > { %540 = vlog2.f32 %v288_v53  ;;  %v325_v57 = vrot.slane %v324_v55, 2  ;;  %v332_v58 = vrot.slane %v331_v56, 2 }
  0x55   : > { %542 = vlog2.f32 %v295_v54 }
  0x56   : > { %v326_v59 = vadd.f32 %v325_v57, %v324_v55  ;;  %v333_v60 = vadd.f32 %v332_v58, %v331_v56 }
  0x58   : > { %v327_v61 = vrot.slane %v326_v59, 1  ;;  %v334_v62 = vrot.slane %v333_v60, 1 }
  0x5a   : > { %v541_v63 = vpop.eup %540  ;;  %v328_v0 = vadd.f32 %v327_v61, %v326_v59  ;;  %v335_v1 = vadd.f32 %v334_v62, %v333_v60 }
  0x5b   : > { %v543_v2 = vpop.eup %542  ;;  %v297_v3 = vmul.f32 0.6931472, %v541_v63 }
  0x5c   : > { %v299_v4 = vmul.f32 0.6931472, %v543_v2  ;;  %v336_v5 = vsub.f32 %v328_v0, %v260_v17  ;;  %v337_v6 = vsub.f32 %v335_v1, %v267_v18 }
  0x5e   : > { %v338_v7 = vsub.f32 %v336_v5, %v297_v3  ;;  %v339_v8 = vsub.f32 %v337_v6, %v299_v4 }
  0x60   : > { %v340_v9 = vmul.f32 1.442695, %v338_v7  ;;  %v342_v10 = vmul.f32 1.442695, %v339_v8 }
  0x62   : > { %544 = vpow2.f32 %v340_v9 }
  0x63   : > { %546 = vpow2.f32 %v342_v10 }
  0x68   : > { %v545_v11 = vpop.eup %544 }
  0x69   : > { %v547_v12 = vpop.eup %546  ;;  %v344_v13 = vsub.f32 1.0, %v545_v11 }
  0x6a   : > { %v345_v14 = vsub.f32 1.0, %v547_v12 }
  0x6b   : > { %v346_v15 = vmax.f32 %v344_v13, 0.0 }
  0x6c   : > { %v347_v16 = vmax.f32 %v345_v14, 0.0 }
  0x6d   : > { %v348_v19 = vmul.f32 %v346_v15, %v346_v15 }
  0x6e   : > { %v349_v20 = vmul.f32 %v347_v16, %v347_v16 }
  0x6f   : > { %v350_v21 = vsub.f32 0.0, %v348_v19 }
  0x70   : > { %v351_v22 = vsub.f32 0.0, %v349_v20 }
  0x71   : > { %v352_v17 = vmul.f32 %v350_v21, %v338_v7 }
  0x72   : > { %v353_v18 = vmul.f32 %v351_v22, %v339_v8 }
  0x73   : > { %v355_v23 = vsel %vm354_vm3, %v352_v17, 0.0 }
  0x74   : > { %v356_v24 = vsel %vm354_vm3, %v353_v18, 0.0 }
  0x75   : > { %v357_v25 = vadd.f32 %v356_v24, %v355_v23 }
  0x77   : > { %358 = vadd.xlane.f32.xlu0 %v357_v25 }
  0xea   : > { %v359_v26 = vpop.xlane.xlu0 %358 }
  0xeb   : > { %v360_v27 = vrot.slane %v359_v26, 4 }
  0xed   : > { %v361_v28 = vadd.f32 %v360_v27, %v359_v26 }
  0xef   : > { %v362_v29 = vrot.slane %v361_v28, 2 }
  0xf1   : > { %v363_v30 = vadd.f32 %v362_v29, %v361_v28 }
  0xf3   : > { %v364_v31 = vrot.slane %v363_v30, 1 }
  0xf5   : > { %v365_v32 = vadd.f32 %v364_v31, %v363_v30 }
  0xf7   : > { %480 = vpush %v365_v32 }
 0x128   : > { %s481_s24 = spop %480 }
 0x129   : > { %v367_v33 = vstv %s481_s24 }
 0x12a   : > { %369 = vst.msk [vmem:[%s244_s22] sm:$0x1] %vm368_vm4, %v367_v33 }
 0x12b PF: > { %s16_s17 = sadd.s32 1, %s628_s17   ;;  %s760_s12 = smov %s612_s13 }
 0x12c   : > { %p13_p0 = scmp.ge.s32.totalorder %s16_s17, 4   ;;  %s761_s13 = smov %s616_s14 }
 0x12d   : > { %s762_s14 = smov %s700_s23  ;;  %s763_s15 = smov %s624_s16 }
 0x12e   : > { %s764_s16 = smov %s766_s18  ;;  %15 = sbr.rel (!%p13_p0) target bundleno = 4 (0x4), region = 75 }
 0x133   :  { %393 = vsyncpa [#allocation3], 1 }
 0x134   :  { %395 = vsyncpa [#allocation3 + $0x1], 1 }

</bundles_post_ra>
